<compile_context>
chip_gen: v7x
topology: tpu7x:2x2x1
jax: 0.10.0
libtpu: 0.0.40
codegen_flags: <defaults>
</compile_context>

<pallas_src>
import functools
import math

import jax
import jax.numpy as jnp
from jax import lax
from jax.experimental import pallas as pl
from jax.experimental.pallas import tpu as pltpu

_EPS = 1e-5
_LANE = 128
_MAX_FOLD_LANES = 512            # cap on lcm(C, 128) for the folded path
_VMEM_LIMIT = 32 * 1024 * 1024   # safe scoped-VMEM limit on v5e/v6e/v7x


# ----------------------------- kernels --------------------------------------


def _ln_rowwise_kernel(x_ref, w_ref, b_ref, o_ref):
    """Block (T, C): normalize each row over its C channels (C = lane dim).

    Used when C is lane-aligned (multiple of 128) or when the folded path
    does not apply.  Two-pass fp32 statistics: mean first, then the variance
    of the centered values (robust when |mean| >> std; same op count as the
    fused E[x^2] - mean^2 form because x - mean is needed anyway).
    """
    x = x_ref[...].astype(jnp.float32)
    inv_c = jnp.float32(1.0 / x.shape[-1])
    mean = jnp.sum(x, axis=-1, keepdims=True) * inv_c
    xc = x - mean
    var = jnp.sum(xc * xc, axis=-1, keepdims=True) * inv_c
    inv = lax.rsqrt(jnp.maximum(var, 0.0) + _EPS)
    w = w_ref[...].astype(jnp.float32)
    b = b_ref[...].astype(jnp.float32)
    o_ref[...] = (xc * inv * w + b).astype(o_ref.dtype)


def _ln_folded_kernel(x_ref, w_ref, b_ref, seg_ref, o_ref, *, dot_precision):
    """Block (T, L) where each lane-row packs g = L // C logical rows.

    Per-group (length-C lane segment) means are computed with a constant
    block-diagonal averaging matmul on the otherwise idle MXU; results come
    back already broadcast across each group's lanes, so every load/store is
    an unmasked lane-dense access and no cross-lane XLU reduction is needed.
    The averaging matrix lives in `seg_ref` (constant block index -> DMA'd
    once), so the body contains no per-step constant rebuilding.
    """
    x = x_ref[...].astype(jnp.float32)
    seg = seg_ref[...]
    # Two-pass statistics: mean first, then variance of the centered values.
    mean = jnp.dot(x, seg, preferred_element_type=jnp.float32,
                   precision=dot_precision)
    xc = x - mean
    var = jnp.dot(xc * xc, seg, preferred_element_type=jnp.float32,
                  precision=dot_precision)
    inv = lax.rsqrt(jnp.maximum(var, 0.0) + _EPS)
    w = w_ref[...].astype(jnp.float32)
    b = b_ref[...].astype(jnp.float32)
    o_ref[...] = (xc * inv * w + b).astype(o_ref.dtype)


# ----------------------------- wrapper helpers -------------------------------


def _round_up(x, m):
    return -(-x // m) * m


def _device_profile():
    """(multi_tensorcore, small_vmem) for the default backend, with fallbacks."""
    kind = ""
    try:
        kind = jax.devices()[0].device_kind.lower()
    except Exception:
        pass
    is_v7 = "v7" in kind      # v7x: 2 TensorCores/chip, 64 MiB physical VMEM
    return is_v7, is_v7


def _choose_tile_rows(n_rows, lane_width, itemsize, *, multi_core, target_bytes):
    """Pick a sublane-aligned row tile sized in bytes (fp32-equivalent).

    Blocks are sized by their fp32 footprint because the kernels keep a few
    block-sized fp32 intermediates regardless of the input dtype.  ~2 MiB
    blocks (1 MiB on v7x) keep in/out double buffers plus those intermediates
    comfortably under the 32 MiB scoped-VMEM limit while making the
    ~0.35 us/grid-step overhead negligible.  On multi-TC parts (v7x) the tile
    is shrunk so the grid has >= 4 steps and both cores stream HBM; on
    single-TC v5e/v6e the largest tile that fits is used.
    """
    sublane = max(8, 32 // max(1, itemsize))   # 8 f32 / 16 bf16 / 32 int8
    if n_rows <= sublane:
        return max(1, n_rows)                  # full-array block (always legal)
    t = max(sublane, target_bytes // (lane_width * 4))
    t = (t // sublane) * sublane
    t = min(t, max(sublane, (n_rows // sublane) * sublane))
    if multi_core:
        t = min(t, _round_up(pl.cdiv(n_rows, 4), sublane))
    return max(sublane, t)


# ----------------------------- wrapper ---------------------------------------


def withbias_layernorm(x, weight, bias, *, tile_rows=None):
    """Restormer WithBias_LayerNorm over the last (channel) dim.

    x: (..., C) channels-last; weight, bias: (C,). Returns x.shape / x.dtype.
    `tile_rows` optionally overrides the automatically chosen row tile.
    """
    orig_shape = x.shape
    c = int(orig_shape[-1])
    rows = int(math.prod(orig_shape[:-1])) if len(orig_shape) > 1 else 1
    x2 = x.reshape(rows, c)
    itemsize = jnp.dtype(x.dtype).itemsize

    multi_tc, small_vmem = _device_profile()
    target_bytes = (1 << 20) if small_vmem else (2 << 20)
    compiler_params = pltpu.CompilerParams(
        # "parallel" shards the 1-D grid across TensorCores on v7x; it is a
        # no-op on single-TC v5e/v6e.
        dimension_semantics=("parallel",),
        vmem_limit_bytes=_VMEM_LIMIT,
    )

    # ---------------- lane-dense folded path (small C) -----------------------
    # Fold g = lcm(C,128)//C logical rows into one lcm(C,128)-lane row so every
    # load/store is an unmasked lane-dense access.  Only taken when the fold is
    # a free contiguous reshape (rows % g == 0): a ragged tail would otherwise
    # force a pad + slice round trip costing extra full HBM passes.
    if 0 < c < _LANE:
        lanes = (c * _LANE) // math.gcd(c, _LANE)   # lcm(C, 128)
        g = lanes // c
        if lanes <= _MAX_FOLD_LANES and rows >= g and rows % g == 0:
            rows_f = rows // g
            xf = x2.reshape(rows_f, lanes)          # contiguous -> free reshape
            wf = jnp.tile(weight.reshape(1, c), (1, g))
            bf = jnp.tile(bias.reshape(1, c), (1, g))
            # Constant block-diagonal segment-averaging matrix, built once here
            # (NOT per grid step inside the kernel) and DMA'd once.
            idx = jnp.arange(lanes, dtype=jnp.int32) // c
            seg_avg = (idx[:, None] == idx[None, :]).astype(jnp.float32)
            seg_avg = seg_avg * jnp.float32(1.0 / c)

            t = tile_rows if tile_rows is not None else _choose_tile_rows(
                rows_f, lanes, itemsize,
                multi_core=multi_tc, target_bytes=target_bytes)
            # Partial last block: OOB writes are clipped by Pallas boundary
            # semantics; rows are independent, so garbage reads in the OOB
            # region never reach valid output.
            grid = (pl.cdiv(rows_f, t),)

            in_specs = [
                pl.BlockSpec((t, lanes), lambda i: (i, 0)),
                pl.BlockSpec((1, lanes), lambda i: (0, 0)),
                pl.BlockSpec((1, lanes), lambda i: (0, 0)),
                pl.BlockSpec((lanes, lanes), lambda i: (0, 0)),
            ]
            out_spec = pl.BlockSpec((t, lanes), lambda i: (i, 0))

            out_f = None
            last_err = None
            # HIGH (bf16_3x) is plenty for a <=512-term average and cheaper
            # than HIGHEST; fall back to HIGHEST if this Mosaic build does not
            # lower Precision.HIGH.  (DEFAULT would truncate x to bf16 and is
            # not accurate enough.)
            for prec in (lax.Precision.HIGH, lax.Precision.HIGHEST):
                try:
                    out_f = pl.pallas_call(
                        functools.partial(_ln_folded_kernel, dot_precision=prec),
                        out_shape=jax.ShapeDtypeStruct((rows_f, lanes), x.dtype),
                        grid_spec=pltpu.PrefetchScalarGridSpec(
                            num_scalar_prefetch=0,
                            grid=grid,
                            in_specs=in_specs,
                            out_specs=out_spec,
                        ),
                        compiler_params=compiler_params,
                    )(xf, wf, bf, seg_avg)
                    break
                except Exception as err:   # retry with the next precision
                    last_err = err
            if out_f is None:
                raise last_err
            return out_f.reshape(orig_shape)

    # ---------------- generic row-wise path ----------------------------------
    # C a multiple of 128 (fully lane-dense), or irregular / ragged cases.
    lane_w = _round_up(max(c, 1), _LANE)   # VMEM footprint is lane-padded
    t = tile_rows if tile_rows is not None else _choose_tile_rows(
        rows, lane_w, itemsize, multi_core=multi_tc, target_bytes=target_bytes)
    grid = (pl.cdiv(rows, t),)             # partial last block: clipped writes

    out = pl.pallas_call(
        _ln_rowwise_kernel,
        out_shape=jax.ShapeDtypeStruct((rows, c), x.dtype),
        grid_spec=pltpu.PrefetchScalarGridSpec(
            num_scalar_prefetch=0,
            grid=grid,
            in_specs=[
                pl.BlockSpec((t, c), lambda i: (i, 0)),
                pl.BlockSpec((1, c), lambda i: (0, 0)),
                pl.BlockSpec((1, c), lambda i: (0, 0)),
            ],
            out_specs=pl.BlockSpec((t, c), lambda i: (i, 0)),
        ),
        compiler_params=compiler_params,
    )(x2, weight.reshape(1, c), bias.reshape(1, c))
    return out.reshape(orig_shape)


# ----------------------------- reference / test ------------------------------


def reference_layernorm(x, weight, bias):
    xf = x.astype(jnp.float32)
    mu = jnp.mean(xf, axis=-1, keepdims=True)
    var = jnp.mean((xf - mu) ** 2, axis=-1, keepdims=True)
    y = (xf - mu) / jnp.sqrt(var + _EPS) * weight.astype(jnp.float32) \
        + bias.astype(jnp.float32)
    return y.astype(x.dtype)


if __name__ == "__main__":
    key = jax.random.PRNGKey(0)

    # (batch, seq, channels, dtype, tile_rows override, atol, rtol)
    configs = [
        (2, 64, 32, jnp.float32, None, 1e-4, 1e-5),   # Restormer C=32 -> folded (L=128, g=4)
        (2, 64, 128, jnp.float32, None, 1e-4, 1e-5),  # lane-aligned C -> row-wise path
        (2, 50, 32, jnp.float32, 8, 1e-4, 1e-5),      # partial (clipped) last grid block
        (2, 64, 48, jnp.float32, None, 1e-4, 1e-5),   # generalized fold: C=48 -> 384 lanes, g=8
        (2, 50, 48, jnp.float32, None, 1e-4, 1e-5),   # ragged fold -> generic row-wise path
        (2, 64, 32, jnp.bfloat16, None, 5e-2, 5e-2),  # bf16 I/O, fp32 compute inside
    ]
    for idx, (b, n, c, dtype, t, atol, rtol) in enumerate(configs):
        key, kx, kw, kb = jax.random.split(key, 4)
        # Non-zero mean offset stresses the statistics' numerical robustness.
        x = (jax.random.normal(kx, (b, n, c), dtype=jnp.float32) + 1.5).astype(dtype)
        weight = 1.0 + 0.1 * jax.random.normal(kw, (c,), dtype=jnp.float32)
        bias = 0.1 * jax.random.normal(kb, (c,), dtype=jnp.float32)

        y = jax.block_until_ready(withbias_layernorm(x, weight, bias, tile_rows=t))
        y_ref = reference_layernorm(x, weight, bias)

        assert y.shape == x.shape and y.dtype == x.dtype, \
            f"shape/dtype mismatch in config {idx}"
        assert jnp.allclose(y.astype(jnp.float32), y_ref.astype(jnp.float32),
                            atol=atol, rtol=rtol), \
            f"mismatch vs reference in config {idx}"

    print("KERNEL_OK")
</pallas_src>

<mosaic_0001>
module attributes {stable_mosaic.version = 11 : i64} {
  func.func @_ln_folded_kernel(%arg0: i32, %arg1: memref<32x128xf32, #tpu.memory_space<vmem>>, %arg2: memref<1x128xf32, #tpu.memory_space<vmem>>, %arg3: memref<1x128xf32, #tpu.memory_space<vmem>>, %arg4: memref<128x128xf32, #tpu.memory_space<vmem>>, %arg5: memref<32x128xf32, #tpu.memory_space<vmem>>) attributes {dimension_semantics = [#tpu.dimension_semantics<parallel>], iteration_bounds = array<i64: 1>, scalar_prefetch = 0 : i64, scratch_operands = 0 : i64, tpu.core_type = #tpu.core_type<tc>, window_params = [{transform_indices = @transform_0, window_bounds = array<i64: 32, 128>}, {pipeline_mode = #tpu.pipeline_mode<synchronous>, transform_indices = @transform_1, window_bounds = array<i64: 1, 128>}, {pipeline_mode = #tpu.pipeline_mode<synchronous>, transform_indices = @transform_2, window_bounds = array<i64: 1, 128>}, {pipeline_mode = #tpu.pipeline_mode<synchronous>, transform_indices = @transform_3, window_bounds = array<i64: 128, 128>}, {transform_indices = @transform_4, window_bounds = array<i64: 32, 128>}]} {
    %c0 = arith.constant 0 : index
    %c0_0 = arith.constant 0 : index
    %0 = vector.load %arg1[%c0, %c0_0] : memref<32x128xf32, #tpu.memory_space<vmem>>, vector<32x128xf32>
    %c0_1 = arith.constant 0 : index
    %c0_2 = arith.constant 0 : index
    %1 = vector.load %arg4[%c0_1, %c0_2] : memref<128x128xf32, #tpu.memory_space<vmem>>, vector<128x128xf32>
    %cst = arith.constant dense<0.000000e+00> : vector<32x128xf32>
    %2 = tpu.matmul %0, %1, %cst {dimension_numbers = #tpu.dot_dimension_numbers<[1], [0], [0], [1], [0, 0, 1, 1], [], []>, precision = #tpu.contract_precision<fp32>} : vector<32x128xf32>, vector<128x128xf32>, vector<32x128xf32> -> vector<32x128xf32>
    %3 = arith.subf %0, %2 : vector<32x128xf32>
    %4 = arith.mulf %3, %3 : vector<32x128xf32>
    %cst_3 = arith.constant dense<0.000000e+00> : vector<32x128xf32>
    %5 = tpu.matmul %4, %1, %cst_3 {dimension_numbers = #tpu.dot_dimension_numbers<[1], [0], [0], [1], [0, 0, 1, 1], [], []>, precision = #tpu.contract_precision<fp32>} : vector<32x128xf32>, vector<128x128xf32>, vector<32x128xf32> -> vector<32x128xf32>
    %cst_4 = arith.constant 0.000000e+00 : f32
    %6 = vector.broadcast %cst_4 : f32 to vector<32x128xf32>
    %7 = arith.maximumf %5, %6 : vector<32x128xf32>
    %cst_5 = arith.constant 9.99999974E-6 : f32
    %8 = vector.broadcast %cst_5 : f32 to vector<32x128xf32>
    %9 = arith.addf %7, %8 : vector<32x128xf32>
    %10 = math.rsqrt %9 : vector<32x128xf32>
    %c0_6 = arith.constant 0 : index
    %c0_7 = arith.constant 0 : index
    %11 = vector.load %arg2[%c0_6, %c0_7] : memref<1x128xf32, #tpu.memory_space<vmem>>, vector<1x128xf32>
    %c0_8 = arith.constant 0 : index
    %c0_9 = arith.constant 0 : index
    %12 = vector.load %arg3[%c0_8, %c0_9] : memref<1x128xf32, #tpu.memory_space<vmem>>, vector<1x128xf32>
    %13 = arith.mulf %3, %10 : vector<32x128xf32>
    %14 = vector.broadcast %11 : vector<1x128xf32> to vector<32x128xf32>
    %15 = arith.mulf %13, %14 : vector<32x128xf32>
    %16 = vector.broadcast %12 : vector<1x128xf32> to vector<32x128xf32>
    %17 = arith.addf %15, %16 : vector<32x128xf32>
    %c0_10 = arith.constant 0 : index
    %c0_11 = arith.constant 0 : index
    %18 = vector.load %arg5[%c0_10, %c0_11] : memref<32x128xf32, #tpu.memory_space<vmem>>, vector<32x128xf32>
    tpu.vector_store %arg5[%c0_10, %c0_11], %17 {strides = array<i32>} : memref<32x128xf32, #tpu.memory_space<vmem>>, vector<32x128xf32>,
    return
  }
  func.func @transform_0(%arg0: i32) -> (i32, i32) {
    %c0_i32 = arith.constant 0 : i32
    %c0_i32_0 = arith.constant 0 : i32
    return %arg0, %c0_i32 : i32, i32
  }
  func.func @transform_1(%arg0: i32) -> (i32, i32) {
    %c0_i32 = arith.constant 0 : i32
    %c0_i32_0 = arith.constant 0 : i32
    %c0_i32_1 = arith.constant 0 : i32
    return %c0_i32, %c0_i32_0 : i32, i32
  }
  func.func @transform_2(%arg0: i32) -> (i32, i32) {
    %c0_i32 = arith.constant 0 : i32
    %c0_i32_0 = arith.constant 0 : i32
    %c0_i32_1 = arith.constant 0 : i32
    return %c0_i32, %c0_i32_0 : i32, i32
  }
  func.func @transform_3(%arg0: i32) -> (i32, i32) {
    %c0_i32 = arith.constant 0 : i32
    %c0_i32_0 = arith.constant 0 : i32
    %c0_i32_1 = arith.constant 0 : i32
    return %c0_i32, %c0_i32_0 : i32, i32
  }
  func.func @transform_4(%arg0: i32) -> (i32, i32) {
    %c0_i32 = arith.constant 0 : i32
    %c0_i32_0 = arith.constant 0 : i32
    return %arg0, %c0_i32 : i32, i32
  }
}

</mosaic_0001>

<bundles_post_ra>
// kernel: tpu_custom_call.1
= control target key start
LH: loop header
LB: loop body
LE: loop exit
PB: predicated region body
PF: predicated region fallthrough
CT: control target
= control target key end

     0   :  { %9 = vsyncpa [#allocation3], 0  ;;  %s3504_s0 = inlined_call_operand.hbm [shape: f32[32,128], index: 0, kind: input, shape index: {}]   ;;  %s3505_s1 = inlined_call_operand.vmem [shape: f32[1,128], index: 1, kind: input, shape index: {}]   ;;  %s3506_s2 = inlined_call_operand.vmem [shape: f32[1,128], index: 2, kind: input, shape index: {}]   ;;  %s3507_s3 = inlined_call_operand.hbm [shape: f32[128,128], index: 3, kind: input, shape index: {}]   ;;  %s3508_s4 = inlined_call_operand.hbm [shape: f32[32,128], index: 4, kind: output, shape index: {}]  }
   0x1   :  { %10 = vsyncpa [#allocation6], 0 }
   0x2   :  { %11 = vsyncpa [#allocation4], 0  ;;  %s2881_s15 = smov [#allocation2]   ;;  %s2809_s19 = scalar_lea.hbm %s3504_s0, 512 }
   0x3   :  { %s17_s16 = sshll.u32 %s2881_s15, 4  ;;  %p2810_p0 = scmp.ne.s32.totalorder %s3504_s0, %s2809_s19  ;;  %s18_s16 = int_to_ptr.vmem [resolvable:$true] %s17_s16 }
   0x4   :  { %p2813_p1 = scmp.lt.u32.totalorder %s2809_s19, %s3504_s0 }
   0x6   :  { %p2815_p2 = pnand %p2813_p1, %p2810_p0 }
   0x8   :  { %2818 = shalt.err (!%p2815_p2)
}
   0x9   :  { %s2819_s24 = scalar_lea.vmem %s18_s16, 512  ;;  %p2824_p4 = scmp.lt.s32.totalorder %s18_s16, %s18_s16 }
   0xa   :  { %p2820_p3 = scmp.ne.s32.totalorder %s18_s16, %s2819_s24  ;;  %p2825_p5 = scmp.lt.s32.totalorder %s2819_s24, %s2819_s24 }
   0xc   :  { %p2826_p6 = por %p2825_p5, %p2824_p4 }
   0xe   :  { %p2827_p7 = pnand %p2826_p6, %p2820_p3 }
  0x10   :  { %2830 = shalt.err (!%p2827_p7)
}
  0x11   :  { %s2882_s25 = smov 128   ;;  %s2883_s26 = smov 8  }
  0x12   :  { %23 = dma.hbm_to_vmem [thread:$0]  %s3504_s0, 512, %s18_s16, [#allocation3], %s2882_s25, %s2882_s25, %s2883_s26  }
  0x13   :  { %s2884_s29 = smov [#allocation5]   ;;  %s2831_s7 = scalar_lea.hbm %s3507_s3, 2048 }
  0x14   :  { %s33_s30 = sshll.u32 %s2884_s29, 4  ;;  %p2832_p8 = scmp.ne.s32.totalorder %s3507_s3, %s2831_s7  ;;  %s34_s30 = int_to_ptr.vmem [resolvable:$true] %s33_s30 }
  0x15   :  { %p2835_p9 = scmp.lt.u32.totalorder %s2831_s7, %s3507_s3 }
  0x17   :  { %p2837_p10 = pnand %p2835_p9, %p2832_p8 }
  0x19   :  { %2840 = shalt.err (!%p2837_p10)
}
  0x1a   :  { %s2841_s12 = scalar_lea.vmem %s34_s30, 2048  ;;  %p2846_p12 = scmp.lt.s32.totalorder %s34_s30, %s34_s30 }
  0x1b   :  { %p2842_p11 = scmp.ne.s32.totalorder %s34_s30, %s2841_s12  ;;  %p2847_p13 = scmp.lt.s32.totalorder %s2841_s12, %s2841_s12 }
  0x1d   :  { %p2848_p0 = por %p2847_p13, %p2846_p12 }
  0x1f   :  { %p2849_p1 = pnand %p2848_p0, %p2842_p11 }
  0x21   :  { %2852 = shalt.err (!%p2849_p1)
}
  0x22   :  { %39 = dma.hbm_to_vmem [thread:$0]  %s3507_s3, 2048, %s34_s30, [#allocation6], %s2882_s25, %s2882_s25, %s2883_s26  }
  0x23   :  { %2875 = dma.done.wait [#allocation3], 512  }
  0x24   :  { %2876 = vsyncadd [#allocation3], 4294966784 }
  0x25   :  { %2877 = dma.done.wait [#allocation6], 2048  }
  0x26   :  { %2878 = vsyncadd [#allocation6], 4294965248  ;;  %v50_v0 = vld [vmem:[#allocation5] sm:$0xff]  ;;  %v51_v1 = vld [vmem:[#allocation5 + $0x8] sm:$0xff] }
  0x27   :  { %v52_v2 = vld [vmem:[#allocation5 + $0x10] sm:$0xff]  ;;  %v67_v3 = vand.u32 4294901760, %v50_v0  ;;  %v70_v4 = vand.u32 4294901760, %v51_v1  ;;  %v53_v5 = vld [vmem:[#allocation5 + $0x18] sm:$0xff]  ;;  %v54_v7 = vld [vmem:[#allocation5 + $0x20] sm:$0xff] }
  0x28   :  { %v73_v6 = vand.u32 4294901760, %v52_v2  ;;  %v55_v8 = vld [vmem:[#allocation5 + $0x28] sm:$0xff]  ;;  %v76_v9 = vand.u32 4294901760, %v53_v5  ;;  %v79_v11 = vand.u32 4294901760, %v54_v7  ;;  %v2945_v14 = vld [vmem:[#allocation5 + $0x30] sm:$0xff]  ;;  %v2947_v15 = vld [vmem:[#allocation5 + $0x38] sm:$0xff] }
  0x29   :  { %v2941_v10 = vpack.c.bf16 %v70_v4, %v67_v3  ;;  %v82_v12 = vand.u32 4294901760, %v55_v8  ;;  %v2950_v16 = vld [vmem:[#allocation2] sm:$0xff]  ;;  %v85_v19 = vand.u32 4294901760, %v2945_v14  ;;  %v88_v20 = vand.u32 4294901760, %v2947_v15  ;;  %v2965_v22 = vld [vmem:[#allocation5 + $0x48] sm:$0xff]  ;;  %v2990_v31 = vld [vmem:[#allocation5 + $0x50] sm:$0xff] }
  0x2a   :  { %v2943_v13 = vpack.c.bf16 %v76_v9, %v73_v6  ;;  %3518 = vst [vmem:[#allocation11_spill] sm:$0xff] %v2950_v16  ;;  %v2955_v17 = vand.u32 4294901760, %v2950_v16  ;;  %v2963_v21 = vld [vmem:[#allocation5 + $0x40] sm:$0xff]  ;;  %v2972_v24 = vld [vmem:[#allocation2 + $0x8] sm:$0xff]  ;;  %v2976_v26 = vsub.f32 %v50_v0, %v67_v3  ;;  %v2978_v27 = vsub.f32 %v51_v1, %v70_v4  ;;  %v2993_v32 = vld [vmem:[#allocation5 + $0x58] sm:$0xff] }
  0x2b   :  { %2373 = vmatprep.subr.bf16.mxu0 %v2941_v10  ;;  %2565 = vmatprep.subr.bf16.mxu1 %v2941_v10  ;;  %v2959_v18 = vpack.c.bf16 %v82_v12, %v79_v11  ;;  %3519 = vst [vmem:[#allocation12_spill] sm:$0xff] %v2972_v24  ;;  %v2986_v28 = vpack.c.bf16 %v88_v20, %v85_v19  ;;  %v91_v29 = vand.u32 4294901760, %v2963_v21  ;;  %v94_v30 = vand.u32 4294901760, %v2965_v22  ;;  %v62_v37 = vld [vmem:[#allocation5 + $0x60] sm:$0xff]  ;;  %v63_v43 = vld [vmem:[#allocation5 + $0x68] sm:$0xff]  ;;  %v64_v44 = vld [vmem:[#allocation5 + $0x70] sm:$0xff] }
  0x2c   :  { %2375 = vmatpush3.bf16.msra.mxu0 %v2941_v10  ;;  %2567 = vmatpush3.bf16.msra.mxu1 %v2941_v10  ;;  %v2969_v23 = vsub.f32 %v2950_v16, %v2955_v17  ;;  %v2999_v34 = vand.u32 4294901760, %v2972_v24  ;;  %v3001_v35 = vsub.f32 %v52_v2, %v73_v6  ;;  %v97_v36 = vand.u32 4294901760, %v2990_v31  ;;  %v65_v47 = vld [vmem:[#allocation5 + $0x78] sm:$0xff]  ;;  %v3045_v63 = vld [vmem:[#allocation2 + $0x10] sm:$0xff] }
  0x2d   :  { %2377 = vmatprep.subr.bf16.mxu0 %v2943_v13  ;;  %2569 = vmatprep.subr.bf16.mxu1 %v2943_v13  ;;  %v190_v39 = vand.u32 4294901760, %v2976_v26  ;;  %v197_v40 = vand.u32 4294901760, %v2978_v27  ;;  %v3009_v41 = vpack.c.bf16 %v94_v30, %v91_v29  ;;  %v100_v42 = vand.u32 4294901760, %v2993_v32  ;;  %3520 = vst [vmem:[#allocation13_spill] sm:$0xff] %v3045_v63 }
  0x2e   :  { %v3511_v25 = vand.u32 4294901760, %v2969_v23  ;;  %v3012_v45 = vsub.f32 %v53_v5, %v76_v9  ;;  %v3014_v46 = vsub.f32 %v54_v7, %v79_v11  ;;  %v3019_v48 = vsub.f32 %v2972_v24, %v2999_v34  ;;  %v3061_v7 = vld [vmem:[#allocation2 + $0x18] sm:$0xff] }
  0x2f   :  { %v204_v49 = vand.u32 4294901760, %v3001_v35  ;;  %v3022_v50 = vsub.f32 %v55_v8, %v82_v12  ;;  %v103_v51 = vand.u32 4294901760, %v62_v37  ;;  %v106_v52 = vand.u32 4294901760, %v63_v43  ;;  %3521 = vst [vmem:[#allocation14_spill] sm:$0xff] %v3061_v7 }
  0x30   :  { %2379 = vmatpush3.bf16.msra.mxu0 %v2943_v13  ;;  %2571 = vmatpush3.bf16.msra.mxu1 %v2943_v13  ;;  %v150_v33 = vsub.f32 %v2969_v23, %v3511_v25  ;;  %v109_v53 = vand.u32 4294901760, %v64_v44  ;;  %v191_v54 = vsub.f32 %v2976_v26, %v190_v39  ;;  %v198_v55 = vsub.f32 %v2978_v27, %v197_v40 }
  0x31   :  { %2381 = vmatprep.subr.bf16.mxu0 %v2959_v18  ;;  %2573 = vmatprep.subr.bf16.mxu1 %v2959_v18  ;;  %v3033_v56 = vpack.c.bf16 %v100_v42, %v97_v36  ;;  %v112_v57 = vand.u32 4294901760, %v65_v47  ;;  %v211_v58 = vand.u32 4294901760, %v3012_v45  ;;  %v218_v59 = vand.u32 4294901760, %v3014_v46 }
  0x32   :  { %v151_v38 = vand.u32 4294901760, %v150_v33  ;;  %v3510_v60 = vand.u32 4294901760, %v3019_v48  ;;  %v3042_v61 = vsub.f32 %v3001_v35, %v204_v49  ;;  %v225_v62 = vand.u32 4294901760, %v3022_v50 }
  0x33   :  { %v3048_v0 = vpack.c.bf16 %v106_v52, %v103_v51  ;;  %v192_v1 = vand.u32 4294901760, %v191_v54  ;;  %v199_v2 = vand.u32 4294901760, %v198_v55  ;;  %v3052_v3 = vpack.c.bf16 %v112_v57, %v109_v53 }
  0x34   :  { %2383 = vmatpush3.bf16.msra.mxu0 %v2959_v18  ;;  %2575 = vmatpush3.bf16.msra.mxu1 %v2959_v18  ;;  %v212_v4 = vsub.f32 %v3012_v45, %v211_v58  ;;  %v3056_v5 = vsub.f32 %v3014_v46, %v218_v59  ;;  %v3059_v6 = vand.u32 4294901760, %v3045_v63  ;;  %v160_v8 = vsub.f32 %v3019_v48, %v3510_v60 }
  0x35   :  { %2385 = vmatprep.subr.bf16.mxu0 %v2986_v28  ;;  %2577 = vmatprep.subr.bf16.mxu1 %v2986_v28  ;;  %v206_v9 = vand.u32 4294901760, %v3042_v61  ;;  %v226_v11 = vsub.f32 %v3022_v50, %v225_v62  ;;  %v3072_v12 = vsub.f32 %v2945_v14, %v85_v19  ;;  %v3077_v33 = vsub.f32 %v2947_v15, %v88_v20 }
  0x36   :  { %1948 = vmatprep.mubr.f32.mxu0 %v151_v38  ;;  %v3080_v38 = vsub.f32 %v2963_v21, %v91_v29  ;;  %v3083_v54 = vsub.f32 %v2965_v22, %v94_v30  ;;  %v3087_v55 = vsub.f32 %v3045_v63, %v3059_v6  ;;  %v3090_v61 = vpack.c.bf16 %v199_v2, %v192_v1 }
  0x37   :  { %v3093_v14 = vsub.f32 %v2990_v31, %v97_v36  ;;  %v3096_v15 = vsub.f32 %v2993_v32, %v100_v42  ;;  %v3099_v19 = vand.u32 4294901760, %v3061_v7  ;;  %v3103_v20 = vsub.f32 %v62_v37, %v103_v51 }
  0x38   :  { %2387 = vmatpush3.bf16.msra.mxu0 %v2986_v28  ;;  %2579 = vmatpush3.bf16.msra.mxu1 %v2986_v28  ;;  %v3105_v21 = vsub.f32 %v63_v43, %v106_v52  ;;  %v3509_v22 = vand.u32 4294901760, %v3087_v55  ;;  %v3108_v29 = vsub.f32 %v64_v44, %v109_v53  ;;  %v161_v30 = vand.u32 4294901760, %v160_v8 }
  0x39   :  { %2389 = vmatprep.subr.bf16.mxu0 %v3009_v41  ;;  %2581 = vmatprep.subr.bf16.mxu1 %v3009_v41  ;;  %v213_v31 = vand.u32 4294901760, %v212_v4  ;;  %v3111_v32 = vsub.f32 %v65_v47, %v112_v57  ;;  %v3115_v36 = vsub.f32 %v3061_v7, %v3099_v19  ;;  %v232_v42 = vand.u32 4294901760, %v3072_v12 }
  0x3a   :  { %v239_v37 = vand.u32 4294901760, %v3077_v33  ;;  %v246_v43 = vand.u32 4294901760, %v3080_v38  ;;  %v253_v51 = vand.u32 4294901760, %v3083_v54  ;;  %v260_v44 = vand.u32 4294901760, %v3093_v14 }
  0x3b   :  { %v267_v52 = vand.u32 4294901760, %v3096_v15  ;;  %v170_v47 = vsub.f32 %v3087_v55, %v3509_v22  ;;  %v3515_v53 = vand.u32 4294901760, %v3115_v36  ;;  %v274_v57 = vand.u32 4294901760, %v3103_v20 }
  0x3c   :  { %2391 = vmatpush3.bf16.msra.mxu0 %v3009_v41  ;;  %2583 = vmatpush3.bf16.msra.mxu1 %v3009_v41  ;;  %v281_v1 = vand.u32 4294901760, %v3105_v21  ;;  %v288_v2 = vand.u32 4294901760, %v3108_v29  ;;  %v3137_v4 = vpack.c.bf16 %v197_v40, %v190_v39  ;;  %v295_v8 = vand.u32 4294901760, %v3111_v32 }
  0x3d   :  { %2393 = vmatprep.subr.bf16.mxu0 %v3033_v56  ;;  %2585 = vmatprep.subr.bf16.mxu1 %v3033_v56  ;;  %v3143_v22 = vpack.c.bf16 %v211_v58, %v204_v49  ;;  %v3145_v60 = vpack.c.bf16 %v225_v62, %v218_v59  ;;  %v3147_v25 = vpack.c.bf16 %v239_v37, %v232_v42  ;;  %v220_v16 = vand.u32 4294901760, %v3056_v5 }
  0x3e   :  { %v180_v63 = vsub.f32 %v3115_v36, %v3515_v53  ;;  %v3152_v7 = vpack.c.bf16 %v253_v51, %v246_v43  ;;  %v3154_v39 = vpack.c.bf16 %v267_v52, %v260_v44  ;;  %v3156_v40 = vpack.c.bf16 %v281_v1, %v274_v57 }
  0x3f   :  { %v227_v49 = vand.u32 4294901760, %v226_v11  ;;  %v171_v58 = vand.u32 4294901760, %v170_v47  ;;  %v3160_v59 = vpack.c.bf16 %v295_v8, %v288_v2  ;;  %v3164_v62 = vpack.c.bf16 %v213_v31, %v206_v9 }
  0x40   :  { %2395 = vmatpush3.bf16.msra.mxu0 %v3033_v56  ;;  %2587 = vmatpush3.bf16.msra.mxu1 %v3033_v56  ;;  %3522 = vst [vmem:[#allocation15_spill] sm:$0xff] %v3156_v40  ;;  %v233_v53 = vsub.f32 %v3072_v12, %v232_v42  ;;  %v240_v24 = vsub.f32 %v3077_v33, %v239_v37  ;;  %v181_v40 = vand.u32 4294901760, %v180_v63 }
  0x41   :  { %2397 = vmatprep.subr.bf16.mxu0 %v3048_v0  ;;  %2589 = vmatprep.subr.bf16.mxu1 %v3048_v0  ;;  %v3170_v5 = vpack.c.bf16 %v227_v49, %v220_v16  ;;  %v247_v9 = vsub.f32 %v3080_v38, %v246_v43  ;;  %v254_v31 = vsub.f32 %v3083_v54, %v253_v51 }
  0x42   :  { %v234_v11 = vand.u32 4294901760, %v233_v53  ;;  %v241_v47 = vand.u32 4294901760, %v240_v24  ;;  %v261_v42 = vsub.f32 %v3093_v14, %v260_v44  ;;  %v268_v37 = vsub.f32 %v3096_v15, %v267_v52 }
  0x43   :  { %v248_v63 = vand.u32 4294901760, %v247_v9  ;;  %v275_v24 = vsub.f32 %v3103_v20, %v274_v57  ;;  %v282_v53 = vsub.f32 %v3105_v21, %v281_v1  ;;  %v296_v57 = vsub.f32 %v3111_v32, %v295_v8 }
  0x44   :  { %2399 = vmatpush3.bf16.msra.mxu0 %v3048_v0  ;;  %2591 = vmatpush3.bf16.msra.mxu1 %v3048_v0  ;;  %v3179_v16 = vpack.c.bf16 %v241_v47, %v234_v11  ;;  %v262_v51 = vand.u32 4294901760, %v261_v42  ;;  %v269_v44 = vand.u32 4294901760, %v268_v37  ;;  %v3212_v8 = vpack.c.bf16 %v3012_v45, %v3001_v35  ;;  %v3531_v42 = vld [vmem:[#allocation13_spill] sm:$0xff] }
  0x45   :  { %2401 = vmatprep.subr.bf16.mxu0 %v3052_v3  ;;  %2593 = vmatprep.subr.bf16.mxu1 %v3052_v3  ;;  %v283_v52 = vand.u32 4294901760, %v282_v53  ;;  %v297_v1 = vand.u32 4294901760, %v296_v57  ;;  %v3234_v35 = vpack.c.bf16 %v3083_v54, %v3080_v38  ;;  %v3240_v45 = vpack.c.bf16 %v3096_v15, %v3093_v14  ;;  %v3528_v54 = vld [vmem:[#allocation12_spill] sm:$0xff]  ;;  %v3529_v15 = vld [vmem:[#allocation11_spill] sm:$0xff] }
  0x46   :  { %v3190_v49 = vpack.c.bf16 %v269_v44, %v262_v51  ;;  %v3526_v38 = vand.u32 4294901760, %v3115_v36 }
  0x48   :  { %2403 = vmatpush3.bf16.msra.mxu0 %v3052_v3  ;;  %2595 = vmatpush3.bf16.msra.mxu1 %v3052_v3 }
  0x49   :  { %2405 = vmatprep.subr.bf16.mxu0 %v3090_v61  ;;  %2597 = vmatprep.subr.bf16.mxu1 %v3090_v61 }
  0x4b   :  { %1949 = vmatmul.mubr.f32.vlgmr.msra.gmra.mrb[0].mxu0 %v161_v30  ;;  %v255_v30 = vand.u32 4294901760, %v254_v31 }
  0x4c   :  { %2407 = vmatpush3.bf16.msra.mxu0 %v3090_v61  ;;  %1951 = vmatprep.mubr.f32.mxu0 %v171_v58  ;;  %v289_v58 = vsub.f32 %v3108_v29, %v288_v2  ;;  %v3206_v2 = vpack.c.bf16 %v2978_v27, %v2976_v26  ;;  %v3220_v26 = vpack.c.bf16 %v3022_v50, %v3014_v46 }
  0x4d   :  { %2409 = vmatprep.subr.bf16.mxu0 %v3164_v62  ;;  %v3185_v43 = vpack.c.bf16 %v255_v30, %v248_v63  ;;  %v3228_v27 = vpack.c.bf16 %v3077_v33, %v3072_v12  ;;  %v3246_v46 = vpack.c.bf16 %v3105_v21, %v3103_v20  ;;  %v3252_v50 = vpack.c.bf16 %v3111_v32, %v3108_v29 }
  0x4e   :  { %v290_v47 = vand.u32 4294901760, %v289_v58  ;;  %v3523_v12 = vand.u32 4294901760, %v2969_v23  ;;  %v3525_v33 = vand.u32 4294901760, %v3087_v55 }
  0x4f   :  { %1952 = vmatmul.mubr.f32.gmra.mrb[2].mxu0 %v181_v40  ;;  %v276_v40 = vand.u32 4294901760, %v275_v24 }
  0x50   :  { %2411 = vmatpush3.bf16.msra.mxu0 %v3164_v62  ;;  %1986 = vmatprep.mubr.f32.mxu0 %v2955_v17  ;;  %v3200_v9 = vpack.c.bf16 %v297_v1, %v290_v47 }
  0x51   :  { %2413 = vmatprep.subr.bf16.mxu0 %v3170_v5  ;;  %v3196_v11 = vpack.c.bf16 %v283_v52, %v276_v40 }
  0x54   :  { %2415 = vmatpush3.bf16.msra.mxu0 %v3170_v5 }
  0x55   :  { %2417 = vmatprep.subr.bf16.mxu0 %v3179_v16 }
  0x58   :  { %2419 = vmatpush3.bf16.msra.mxu0 %v3179_v16 }
  0x59   :  { %2421 = vmatprep.subr.bf16.mxu0 %v3185_v43 }
  0x5c   :  { %2423 = vmatpush3.bf16.msra.mxu0 %v3185_v43 }
  0x5d   :  { %2425 = vmatprep.subr.bf16.mxu0 %v3190_v49 }
  0x60   :  { %2427 = vmatpush3.bf16.msra.mxu0 %v3190_v49 }
  0x61   :  { %2429 = vmatprep.subr.bf16.mxu0 %v3196_v11 }
  0x64   :  { %2431 = vmatpush3.bf16.msra.mxu0 %v3196_v11 }
  0x65   :  { %2433 = vmatprep.subr.bf16.mxu0 %v3200_v9 }
  0x68   :  { %2435 = vmatpush3.bf16.msra.mxu0 %v3200_v9 }
  0x69   :  { %2437 = vmatprep.subr.bf16.mxu0 %v3206_v2 }
  0x6b   :  { %1987 = vmatmul.mubr.f32.vlgmr.msra.gmra.mrb[0].mxu0 %v2999_v34 }
  0x6c   :  { %2439 = vmatpush3.bf16.msra.mxu0 %v3206_v2  ;;  %1989 = vmatprep.mubr.f32.mxu0 %v3059_v6 }
  0x6d   :  { %2441 = vmatprep.subr.bf16.mxu0 %v3212_v8 }
  0x6f   :  { %1990 = vmatmul.mubr.f32.gmra.mrb[2].mxu0 %v3099_v19 }
  0x70   :  { %2443 = vmatpush3.bf16.msra.mxu0 %v3212_v8  ;;  %2024 = vmatprep.mubr.f32.mxu0 %v2969_v23  ;;  %v3524_v23 = vand.u32 4294901760, %v3019_v48 }
  0x71   :  { %2445 = vmatprep.subr.bf16.mxu0 %v3220_v26 }
  0x74   :  { %2447 = vmatpush3.bf16.msra.mxu0 %v3220_v26 }
  0x75   :  { %2449 = vmatprep.subr.bf16.mxu0 %v3228_v27 }
  0x78   :  { %2451 = vmatpush3.bf16.msra.mxu0 %v3228_v27 }
  0x79   :  { %2453 = vmatprep.subr.bf16.mxu0 %v3234_v35 }
  0x7c   :  { %2455 = vmatpush3.bf16.msra.mxu0 %v3234_v35 }
  0x7d   :  { %2457 = vmatprep.subr.bf16.mxu0 %v3240_v45 }
  0x80   :  { %2459 = vmatpush3.bf16.msra.mxu0 %v3240_v45 }
  0x81   :  { %2461 = vmatprep.subr.bf16.mxu0 %v3246_v46 }
  0x84   :  { %2463 = vmatpush3.bf16.msra.mxu0 %v3246_v46 }
  0x85   :  { %2465 = vmatprep.subr.bf16.mxu0 %v3252_v50 }
  0x88   :  { %2467 = vmatpush3.bf16.msra.mxu0 %v3252_v50 }
  0x89   :  { %2469 = vmatprep.subr.bf16.mxu0 %v2941_v10 }
  0x8b   :  { %2025 = vmatmul.mubr.f32.vlgmr.msra.gmra.mrb[0].mxu0 %v3019_v48  ;;  %v3527_v48 = vld [vmem:[#allocation15_spill] sm:$0xff] }
  0x8c   :  { %2471 = vmatpush3.bf16.msra.mxu0 %v2941_v10  ;;  %2027 = vmatprep.mubr.f32.mxu0 %v3087_v55 }
  0x8d   :  { %2473 = vmatprep.subr.bf16.mxu0 %v2943_v13 }
  0x8f   :  { %2028 = vmatmul.mubr.f32.gmra.mrb[2].mxu0 %v3115_v36 }
  0x90   :  { %2475 = vmatpush3.bf16.msra.mxu0 %v2943_v13  ;;  %2062 = vmatprep.mubr.f32.mxu0 %v3523_v12 }
  0x91   :  { %2477 = vmatprep.subr.bf16.mxu0 %v2959_v18 }
  0x94   :  { %2479 = vmatpush3.bf16.msra.mxu0 %v2959_v18 }
  0x95   :  { %2481 = vmatprep.subr.bf16.mxu0 %v2986_v28 }
  0x98   :  { %2483 = vmatpush3.bf16.msra.mxu0 %v2986_v28 }
  0x99   :  { %2485 = vmatprep.subr.bf16.mxu0 %v3009_v41 }
  0x9c   :  { %2487 = vmatpush3.bf16.msra.mxu0 %v3009_v41 }
  0x9d   :  { %2489 = vmatprep.subr.bf16.mxu0 %v3033_v56 }
  0xa0   :  { %2491 = vmatpush3.bf16.msra.mxu0 %v3033_v56 }
  0xa1   :  { %2493 = vmatprep.subr.bf16.mxu0 %v3048_v0 }
  0xa4   :  { %2495 = vmatpush3.bf16.msra.mxu0 %v3048_v0 }
  0xa5   :  { %2497 = vmatprep.subr.bf16.mxu0 %v3052_v3 }
  0xa8   :  { %2499 = vmatpush3.bf16.msra.mxu0 %v3052_v3 }
  0xa9   :  { %2501 = vmatprep.subr.bf16.mxu0 %v3137_v4 }
  0xab   :  { %2063 = vmatmul.mubr.f32.vlgmr.msra.gmra.mrb[0].mxu0 %v3524_v23 }
  0xac   :  { %2503 = vmatpush3.bf16.msra.mxu0 %v3137_v4  ;;  %2065 = vmatprep.mubr.f32.mxu0 %v3525_v33 }
  0xad   :  { %2505 = vmatprep.subr.bf16.mxu0 %v3143_v22 }
  0xaf   :  { %2066 = vmatmul.mubr.f32.gmra.mrb[2].mxu0 %v3526_v38 }
  0xb0   :  { %2507 = vmatpush3.bf16.msra.mxu0 %v3143_v22  ;;  %2100 = vmatprep.mubr.f32.mxu0 %v2955_v17 }
  0xb1   :  { %2509 = vmatprep.subr.bf16.mxu0 %v3145_v60 }
  0xb4   :  { %2511 = vmatpush3.bf16.msra.mxu0 %v3145_v60 }
  0xb5   :  { %2513 = vmatprep.subr.bf16.mxu0 %v3147_v25 }
  0xb8   :  { %2515 = vmatpush3.bf16.msra.mxu0 %v3147_v25 }
  0xb9   :  { %2517 = vmatprep.subr.bf16.mxu0 %v3152_v7 }
  0xbc   :  { %2519 = vmatpush3.bf16.msra.mxu0 %v3152_v7 }
  0xbd   :  { %2521 = vmatprep.subr.bf16.mxu0 %v3154_v39 }
  0xc0   :  { %2523 = vmatpush3.bf16.msra.mxu0 %v3154_v39 }
  0xc1   :  { %2525 = vmatprep.subr.bf16.mxu0 %v3527_v48 }
  0xc4   :  { %2527 = vmatpush3.bf16.msra.mxu0 %v3527_v48 }
  0xc5   :  { %2529 = vmatprep.subr.bf16.mxu0 %v3160_v59 }
  0xc8   :  { %2531 = vmatpush3.bf16.msra.mxu0 %v3160_v59 }
  0xc9   :  { %2533 = vmatprep.subr.bf16.mxu0 %v2941_v10 }
  0xcb   :  { %2101 = vmatmul.mubr.f32.vlgmr.msra.gmra.mrb[0].mxu0 %v2999_v34 }
  0xcc   :  { %2535 = vmatpush3.bf16.msra.mxu0 %v2941_v10  ;;  %2103 = vmatprep.mubr.f32.mxu0 %v3059_v6 }
  0xcd   :  { %2537 = vmatprep.subr.bf16.mxu0 %v2943_v13 }
  0xcf   :  { %2104 = vmatmul.mubr.f32.gmra.mrb[2].mxu0 %v3099_v19 }
  0xd0   :  { %2539 = vmatpush3.bf16.msra.mxu0 %v2943_v13  ;;  %2138 = vmatprep.mubr.f32.mxu0 %v2955_v17 }
  0xd1   :  { %2541 = vmatprep.subr.bf16.mxu0 %v2959_v18 }
  0xd4   :  { %2543 = vmatpush3.bf16.msra.mxu0 %v2959_v18 }
  0xd5   :  { %2545 = vmatprep.subr.bf16.mxu0 %v2986_v28 }
  0xd8   :  { %2547 = vmatpush3.bf16.msra.mxu0 %v2986_v28 }
  0xd9   :  { %2549 = vmatprep.subr.bf16.mxu0 %v3009_v41 }
  0xdc   :  { %2551 = vmatpush3.bf16.msra.mxu0 %v3009_v41 }
  0xdd   :  { %2553 = vmatprep.subr.bf16.mxu0 %v3033_v56 }
  0xe0   :  { %2555 = vmatpush3.bf16.msra.mxu0 %v3033_v56 }
  0xe1   :  { %2557 = vmatprep.subr.bf16.mxu0 %v3048_v0 }
  0xe4   :  { %2559 = vmatpush3.bf16.msra.mxu0 %v3048_v0 }
  0xe5   :  { %2561 = vmatprep.subr.bf16.mxu0 %v3052_v3 }
  0xe8   :  { %2563 = vmatpush3.bf16.msra.mxu0 %v3052_v3 }
  0xeb   :  { %2139 = vmatmul.mubr.f32.vlgmr.msra.gmra.mrb[0].mxu0 %v2999_v34 }
  0xec   :  { %2141 = vmatprep.mubr.f32.mxu0 %v3059_v6  ;;  %v3530_v6 = vld [vmem:[#allocation14_spill] sm:$0xff] }
  0xef   :  { %2142 = vmatmul.mubr.f32.gmra.mrb[2].mxu0 %v3099_v19 }
 0x1be   :  { %v2140_v17 = vpop.f32.mrb[0].mxu0 }
 0x1bf   :  { %v3325_v55 = vsub.f32 %v3528_v54, %v2140_v17  ;;  %v814_v14 = vpop.f32.mrb[1].mxu0 }
 0x1c0   :  { %v3328_v20 = vsub.f32 %v3529_v15, %v814_v14 }
 0x1c1   :  { %v841_v21 = vmul.f32 %v3325_v55, %v3325_v55 }
 0x1c2   :  { %v840_v29 = vmul.f32 %v3328_v20, %v3328_v20  ;;  %v2143_v32 = vpop.f32.mrb[2].mxu0 }
 0x1c3   :  { %v3334_v34 = vand.u32 4294901760, %v841_v21  ;;  %v3337_v36 = vsub.f32 %v3530_v6, %v2143_v32  ;;  %v826_v19 = vpop.f32.mrb[3].mxu0 }
 0x1c4   :  { %v3339_v31 = vand.u32 4294901760, %v840_v29  ;;  %v3342_v63 = vsub.f32 %v3531_v42, %v826_v19 }
 0x1c5   :  { %v3345_v30 = vsub.f32 %v841_v21, %v3334_v34  ;;  %v843_v37 = vmul.f32 %v3337_v36, %v3337_v36 }
 0x1c6   :  { %v3350_v24 = vsub.f32 %v840_v29, %v3339_v31  ;;  %v842_v51 = vmul.f32 %v3342_v63, %v3342_v63 }
 0x1c7   :  { %v3354_v44 = vand.u32 4294901760, %v843_v37  ;;  %v937_v53 = vand.u32 4294901760, %v3345_v30 }
 0x1c8   :  { %v3357_v40 = vand.u32 4294901760, %v842_v51  ;;  %v927_v52 = vand.u32 4294901760, %v3350_v24 }
 0x1c9   :  { %v3361_v58 = vsub.f32 %v843_v37, %v3354_v44  ;;  %v938_v57 = vsub.f32 %v3345_v30, %v937_v53 }
 0x1ca   :  { %v3367_v47 = vsub.f32 %v842_v51, %v3357_v40  ;;  %v928_v1 = vsub.f32 %v3350_v24, %v927_v52 }
 0x1cb   :  { %v957_v12 = vand.u32 4294901760, %v3361_v58  ;;  %v939_v38 = vand.u32 4294901760, %v938_v57 }
 0x1cc   :  { %v929_v23 = vand.u32 4294901760, %v928_v1  ;;  %v947_v33 = vand.u32 4294901760, %v3367_v47 }
 0x1cd   :  { %v958_v17 = vsub.f32 %v3361_v58, %v957_v12 }
 0x1ce   :  { %2176 = vmatprep.mubr.f32.mxu1 %v929_v23  ;;  %v948_v54 = vsub.f32 %v3367_v47, %v947_v33 }
 0x1cf   :  { %2177 = vmatmul.mubr.f32.vlgmr.msra.gmra.mrb[0].mxu1 %v939_v38  ;;  %v959_v15 = vand.u32 4294901760, %v958_v17 }
 0x1d0   :  { %2599 = vmatpush3.bf16.msra.mxu1 %v3090_v61  ;;  %v949_v14 = vand.u32 4294901760, %v948_v54 }
 0x1d1   :  { %2601 = vmatprep.subr.bf16.mxu1 %v3164_v62 }
 0x1d2   :  { %2179 = vmatprep.mubr.f32.mxu1 %v949_v14 }
 0x1d3   :  { %2180 = vmatmul.mubr.f32.gmra.mrb[2].mxu1 %v959_v15 }
 0x1d4   :  { %2603 = vmatpush3.bf16.msra.mxu1 %v3164_v62  ;;  %2214 = vmatprep.mubr.f32.mxu1 %v3339_v31 }
 0x1d5   :  { %2605 = vmatprep.subr.bf16.mxu1 %v3170_v5 }
 0x1d8   :  { %2607 = vmatpush3.bf16.msra.mxu1 %v3170_v5  ;;  %v1675_v5 = vld [vmem:[%s3506_s2] ss:$0 sm:$0xff] }
 0x1d9   :  { %2609 = vmatprep.subr.bf16.mxu1 %v3179_v16 }
 0x1dc   :  { %2611 = vmatpush3.bf16.msra.mxu1 %v3179_v16 }
 0x1dd   :  { %2613 = vmatprep.subr.bf16.mxu1 %v3185_v43 }
 0x1e0   :  { %2615 = vmatpush3.bf16.msra.mxu1 %v3185_v43 }
 0x1e1   :  { %2617 = vmatprep.subr.bf16.mxu1 %v3190_v49 }
 0x1e4   :  { %2619 = vmatpush3.bf16.msra.mxu1 %v3190_v49 }
 0x1e5   :  { %2621 = vmatprep.subr.bf16.mxu1 %v3196_v11 }
 0x1e8   :  { %2623 = vmatpush3.bf16.msra.mxu1 %v3196_v11 }
 0x1e9   :  { %2625 = vmatprep.subr.bf16.mxu1 %v3200_v9 }
 0x1ec   :  { %2627 = vmatpush3.bf16.msra.mxu1 %v3200_v9 }
 0x1ed   :  { %2629 = vmatprep.subr.bf16.mxu1 %v3206_v2 }
 0x1ef   :  { %2215 = vmatmul.mubr.f32.vlgmr.msra.gmra.mrb[0].mxu1 %v3334_v34 }
 0x1f0   :  { %2217 = vmatprep.mubr.f32.mxu1 %v3357_v40  ;;  %2631 = vmatpush3.bf16.msra.mxu1 %v3206_v2 }
 0x1f1   :  { %2633 = vmatprep.subr.bf16.mxu1 %v3212_v8 }
 0x1f3   :  { %2218 = vmatmul.mubr.f32.gmra.mrb[2].mxu1 %v3354_v44 }
 0x1f4   :  { %2635 = vmatpush3.bf16.msra.mxu1 %v3212_v8  ;;  %2252 = vmatprep.mubr.f32.mxu1 %v3350_v24 }
 0x1f5   :  { %2637 = vmatprep.subr.bf16.mxu1 %v3220_v26 }
 0x1f8   :  { %2639 = vmatpush3.bf16.msra.mxu1 %v3220_v26 }
 0x1f9   :  { %2641 = vmatprep.subr.bf16.mxu1 %v3228_v27 }
 0x1fc   :  { %2643 = vmatpush3.bf16.msra.mxu1 %v3228_v27 }
 0x1fd   :  { %2645 = vmatprep.subr.bf16.mxu1 %v3234_v35 }
 0x200   :  { %2647 = vmatpush3.bf16.msra.mxu1 %v3234_v35 }
 0x201   :  { %2649 = vmatprep.subr.bf16.mxu1 %v3240_v45 }
 0x204   :  { %2651 = vmatpush3.bf16.msra.mxu1 %v3240_v45 }
 0x205   :  { %2653 = vmatprep.subr.bf16.mxu1 %v3246_v46 }
 0x208   :  { %2655 = vmatpush3.bf16.msra.mxu1 %v3246_v46 }
 0x209   :  { %2657 = vmatprep.subr.bf16.mxu1 %v3252_v50 }
 0x20c   :  { %2659 = vmatpush3.bf16.msra.mxu1 %v3252_v50 }
 0x20d   :  { %2661 = vmatprep.subr.bf16.mxu1 %v2941_v10 }
 0x20f   :  { %2253 = vmatmul.mubr.f32.vlgmr.msra.gmra.mrb[0].mxu1 %v3345_v30 }
 0x210   :  { %2255 = vmatprep.mubr.f32.mxu1 %v3367_v47  ;;  %2663 = vmatpush3.bf16.msra.mxu1 %v2941_v10 }
 0x211   :  { %2665 = vmatprep.subr.bf16.mxu1 %v2943_v13 }
 0x213   :  { %2256 = vmatmul.mubr.f32.gmra.mrb[2].mxu1 %v3361_v58 }
 0x214   :  { %2667 = vmatpush3.bf16.msra.mxu1 %v2943_v13  ;;  %2290 = vmatprep.mubr.f32.mxu1 %v927_v52 }
 0x215   :  { %2669 = vmatprep.subr.bf16.mxu1 %v2959_v18 }
 0x218   :  { %2671 = vmatpush3.bf16.msra.mxu1 %v2959_v18 }
 0x219   :  { %2673 = vmatprep.subr.bf16.mxu1 %v2986_v28 }
 0x21c   :  { %2675 = vmatpush3.bf16.msra.mxu1 %v2986_v28 }
 0x21d   :  { %2677 = vmatprep.subr.bf16.mxu1 %v3009_v41 }
 0x220   :  { %2679 = vmatpush3.bf16.msra.mxu1 %v3009_v41 }
 0x221   :  { %2681 = vmatprep.subr.bf16.mxu1 %v3033_v56 }
 0x224   :  { %2683 = vmatpush3.bf16.msra.mxu1 %v3033_v56 }
 0x225   :  { %2685 = vmatprep.subr.bf16.mxu1 %v3048_v0 }
 0x228   :  { %2687 = vmatpush3.bf16.msra.mxu1 %v3048_v0 }
 0x229   :  { %2689 = vmatprep.subr.bf16.mxu1 %v3052_v3 }
 0x22c   :  { %2691 = vmatpush3.bf16.msra.mxu1 %v3052_v3 }
 0x22d   :  { %2693 = vmatprep.subr.bf16.mxu1 %v3137_v4 }
 0x22f   :  { %2291 = vmatmul.mubr.f32.vlgmr.msra.gmra.mrb[0].mxu1 %v937_v53 }
 0x230   :  { %2293 = vmatprep.mubr.f32.mxu1 %v947_v33  ;;  %2695 = vmatpush3.bf16.msra.mxu1 %v3137_v4  ;;  %v1674_v4 = vld [vmem:[%s3505_s1] ss:$0 sm:$0xff]  ;;  %s2885_s1 = smov [#allocation7]  }
 0x231   :  { %2697 = vmatprep.subr.bf16.mxu1 %v3143_v22  ;;  %s1661_s17 = sshll.u32 %s2885_s1, 4  ;;  %s1662_s17 = int_to_ptr.vmem [resolvable:$true] %s1661_s17 }
 0x232   :  { %s2853_s2 = scalar_lea.vmem %s1662_s17, 512  ;;  %p2858_p3 = scmp.lt.s32.totalorder %s1662_s17, %s1662_s17 }
 0x233   :  { %2294 = vmatmul.mubr.f32.gmra.mrb[2].mxu1 %v957_v12  ;;  %p2854_p2 = scmp.ne.s32.totalorder %s1662_s17, %s2853_s2  ;;  %p2859_p4 = scmp.lt.s32.totalorder %s2853_s2, %s2853_s2 }
 0x234   :  { %2699 = vmatpush3.bf16.msra.mxu1 %v3143_v22  ;;  %2328 = vmatprep.mubr.f32.mxu1 %v3339_v31 }
 0x235   :  { %2701 = vmatprep.subr.bf16.mxu1 %v3145_v60  ;;  %p2860_p5 = por %p2859_p4, %p2858_p3 }
 0x237   :  { %p2861_p6 = pnand %p2860_p5, %p2854_p2 }
 0x238   :  { %2703 = vmatpush3.bf16.msra.mxu1 %v3145_v60 }
 0x239   :  { %2705 = vmatprep.subr.bf16.mxu1 %v3147_v25 }
 0x23c   :  { %2707 = vmatpush3.bf16.msra.mxu1 %v3147_v25 }
 0x23d   :  { %2709 = vmatprep.subr.bf16.mxu1 %v3152_v7 }
 0x240   :  { %2711 = vmatpush3.bf16.msra.mxu1 %v3152_v7 }
 0x241   :  { %2713 = vmatprep.subr.bf16.mxu1 %v3154_v39 }
 0x244   :  { %2715 = vmatpush3.bf16.msra.mxu1 %v3154_v39 }
 0x245   :  { %2717 = vmatprep.subr.bf16.mxu1 %v3527_v48 }
 0x248   :  { %2719 = vmatpush3.bf16.msra.mxu1 %v3527_v48 }
 0x249   :  { %2721 = vmatprep.subr.bf16.mxu1 %v3160_v59 }
 0x24c   :  { %2723 = vmatpush3.bf16.msra.mxu1 %v3160_v59 }
 0x24d   :  { %2725 = vmatprep.subr.bf16.mxu1 %v2941_v10 }
 0x24f   :  { %2329 = vmatmul.mubr.f32.vlgmr.msra.gmra.mrb[0].mxu1 %v3334_v34 }
 0x250   :  { %2331 = vmatprep.mubr.f32.mxu1 %v3357_v40  ;;  %2727 = vmatpush3.bf16.msra.mxu1 %v2941_v10 }
 0x251   :  { %2729 = vmatprep.subr.bf16.mxu1 %v2943_v13 }
 0x253   :  { %2332 = vmatmul.mubr.f32.gmra.mrb[2].mxu1 %v3354_v44 }
 0x254   :  { %2731 = vmatpush3.bf16.msra.mxu1 %v2943_v13  ;;  %2366 = vmatprep.mubr.f32.mxu1 %v3339_v31 }
 0x255   :  { %2733 = vmatprep.subr.bf16.mxu1 %v2959_v18 }
 0x258   :  { %2735 = vmatpush3.bf16.msra.mxu1 %v2959_v18 }
 0x259   :  { %2737 = vmatprep.subr.bf16.mxu1 %v2986_v28 }
 0x25c   :  { %2739 = vmatpush3.bf16.msra.mxu1 %v2986_v28 }
 0x25d   :  { %2741 = vmatprep.subr.bf16.mxu1 %v3009_v41 }
 0x260   :  { %2743 = vmatpush3.bf16.msra.mxu1 %v3009_v41 }
 0x261   :  { %2745 = vmatprep.subr.bf16.mxu1 %v3033_v56 }
 0x264   :  { %2747 = vmatpush3.bf16.msra.mxu1 %v3033_v56 }
 0x265   :  { %2749 = vmatprep.subr.bf16.mxu1 %v3048_v0 }
 0x268   :  { %2751 = vmatpush3.bf16.msra.mxu1 %v3048_v0 }
 0x269   :  { %2753 = vmatprep.subr.bf16.mxu1 %v3052_v3 }
 0x26c   :  { %2755 = vmatpush3.bf16.msra.mxu1 %v3052_v3 }
 0x26f   :  { %2367 = vmatmul.mubr.f32.vlgmr.msra.gmra.mrb[0].mxu1 %v3334_v34 }
 0x270   :  { %2369 = vmatprep.mubr.f32.mxu1 %v3357_v40 }
 0x273   :  { %2370 = vmatmul.mubr.f32.gmra.mrb[2].mxu1 %v3354_v44 }
 0x342   :  { %v2368_v10 = vpop.f32.mrb[0].mxu1 }
 0x343   :  { %v1615_v13 = vmax.f32 %v2368_v10, 0.0  ;;  %v1592_v18 = vpop.f32.mrb[1].mxu1 }
 0x344   :  { %v1614_v25 = vmax.f32 %v1592_v18, 0.0 }
 0x345   :  { %v1619_v28 = vadd.f32 1e-05, %v1615_v13 }
 0x346   :  { %v1618_v41 = vadd.f32 1e-05, %v1614_v25  ;;  %v2371_v56 = vpop.f32.mrb[2].mxu1 }
 0x347   :  { %2801 = vrsqrt.f32 %v1619_v28  ;;  %v1617_v60 = vmax.f32 %v2371_v56, 0.0  ;;  %v1604_v0 = vpop.f32.mrb[3].mxu1 }
 0x348   :  { %2803 = vrsqrt.f32 %v1618_v41  ;;  %v1616_v7 = vmax.f32 %v1604_v0, 0.0 }
 0x349   :  { %v1621_v61 = vadd.f32 1e-05, %v1617_v60 }
 0x34a   :  { %v1620_v3 = vadd.f32 1e-05, %v1616_v7 }
 0x34b   :  { %2805 = vrsqrt.f32 %v1621_v61 }
 0x34c   :  { %2807 = vrsqrt.f32 %v1620_v3 }
 0x351   :  { %v2802_v22 = vpop.eup %2801 }
 0x352   :  { %v2804_v39 = vpop.eup %2803  ;;  %v1629_v59 = vmul.f32 %v2802_v22, %v3325_v55 }
 0x353   :  { %v1628_v62 = vmul.f32 %v2804_v39, %v3328_v20 }
 0x354   :  { %v1639_v16 = vmul.f32 %v1674_v4, %v1629_v59 }
 0x355   :  { %v2806_v43 = vpop.eup %2805  ;;  %v1638_v49 = vmul.f32 %v1674_v4, %v1628_v62 }
 0x356   :  { %v2808_v11 = vpop.eup %2807  ;;  %v1631_v9 = vmul.f32 %v2806_v43, %v3337_v36  ;;  %v1649_v2 = vadd.f32 %v1675_v5, %v1639_v16 }
 0x357   :  { %v1630_v8 = vmul.f32 %v2808_v11, %v3342_v63  ;;  %v1648_v26 = vadd.f32 %v1675_v5, %v1638_v49 }
 0x358   :  { %v1641_v27 = vmul.f32 %v1674_v4, %v1631_v9  ;;  %1653 = vst [vmem:[#allocation7 + $0x8] sm:$0xff] %v1649_v2 }
 0x359   :  { %v1640_v35 = vmul.f32 %v1674_v4, %v1630_v8  ;;  %1652 = vst [vmem:[#allocation7] sm:$0xff] %v1648_v26 }
 0x35a   :  { %v1651_v45 = vadd.f32 %v1675_v5, %v1641_v27 }
 0x35b   :  { %v1650_v46 = vadd.f32 %v1675_v5, %v1640_v35 }
 0x35c   :  { %1655 = vst [vmem:[#allocation7 + $0x18] sm:$0xff] %v1651_v45 }
 0x35d   :  { %1654 = vst [vmem:[#allocation7 + $0x10] sm:$0xff] %v1650_v46 }
 0x35e   :  { %2864 = shalt.err (!%p2861_p6)
}
 0x35f   :  { %s2865_s20 = scalar_lea.hbm %s3508_s4, 512 }
 0x360   :  { %p2866_p7 = scmp.ne.s32.totalorder %s3508_s4, %s2865_s20  ;;  %p2869_p8 = scmp.lt.u32.totalorder %s2865_s20, %s3508_s4 }
 0x362   :  { %p2871_p9 = pnand %p2869_p8, %p2866_p7 }
 0x364   :  { %2874 = shalt.err (!%p2871_p9)
}
 0x365   :  { %1667 = dma.vmem_to_hbm [thread:$0]  %s1662_s17, 512, %s3508_s4, [#allocation4], %s2882_s25, %s2882_s25, %s2883_s26  }
 0x366   :  { %2879 = dma.done.wait [#allocation4], 512  }
 0x367   :  { %2880 = vsyncadd [#allocation4], 4294966784 }
 0x368   :  { %1671 = vsyncpa [#allocation3], 1 }
 0x369   :  { %1672 = vsyncpa [#allocation6], 1 }
 0x36a   :  { %1673 = vsyncpa [#allocation4], 1 }

</bundles_post_ra>
